<compile_context>
chip_gen: v5e
topology: v5e:2x2
jax: 0.10.0
libtpu: 0.0.40
codegen_flags: <defaults>
</compile_context>

<pallas_src>
import jax
import jax.numpy as jnp
from jax.experimental import pallas as pl
from jax.experimental.pallas import tpu as pltpu


def _ps_head_kernel(x_ref, w_ref, slot_ref, mark_ref):
    # x_ref:    (C, TP)            pixel tile: channels on sublanes, pixels on lanes
    # w_ref:    (OC_pad, C)        fused [slot; 0-pad; mark] 1x1-conv weights
    # slot_ref: (SLOT_CH, TP)
    # mark_ref: (MARK_CH, TP)
    slot_ch = slot_ref.shape[0]
    mark_ch = mark_ref.shape[0]
    slot_pad = ((slot_ch + 7) // 8) * 8      # mark rows start on a sublane boundary
    # Default MXU precision truncates f32 inputs toward bf16 passes; with C=32
    # and a saturating sigmoid this is fine.  Use precision=HIGHEST for closer
    # parity with the PyTorch f32 conv if ever needed.
    y = jnp.dot(w_ref[...], x_ref[...], preferred_element_type=jnp.float32)
    y = jax.nn.sigmoid(y)                    # f32 sigmoid (no bf16 EUP on v5e)
    slot_ref[...] = y[:slot_ch].astype(slot_ref.dtype)
    mark_ref[...] = y[slot_pad:slot_pad + mark_ch].astype(mark_ref.dtype)


def transformer_ps_head(x_nchw, w_slot, w_mark, *, tile_pix=16384):
    """x_nchw: (B, C, H, W); w_slot: (slot_ch, C, 1, 1); w_mark: (mark_ch, C, 1, 1).

    Returns (slot_out, mark_out) in NCHW, matching the PyTorch module.
    """
    B, C, H, W = x_nchw.shape
    slot_ch = w_slot.shape[0]
    mark_ch = w_mark.shape[0]
    oc = slot_ch + mark_ch
    HW = H * W
    dtype = x_nchw.dtype
    itemsize = jnp.dtype(dtype).itemsize

    # NCHW-native flattening: contiguous reshape only, no HBM transpose.
    x = x_nchw.reshape(B, C, HW)

    # Fuse the two 1x1-conv weights into one (OC_pad, C) matrix with the mark
    # rows aligned to the next sublane-multiple-of-8 boundary (zero rows in
    # between).  The padded rows produce throwaway outputs that are never stored.
    slot_pad = ((slot_ch + 7) // 8) * 8
    oc_pad = slot_pad + mark_ch
    w = jnp.zeros((oc_pad, C), dtype=dtype)
    w = w.at[:slot_ch].set(w_slot.reshape(slot_ch, C).astype(dtype))
    w = w.at[slot_pad:slot_pad + mark_ch].set(w_mark.reshape(mark_ch, C).astype(dtype))

    # Pixel tile: HBM-bandwidth bound, so take the largest lane-dense tile that
    # the problem allows.  If everything fits in one tile, drop the pixel grid
    # axis entirely (small-problem fast path).
    tile_pix = max(128, (tile_pix // 128) * 128)
    if HW <= tile_pix:
        tp = HW                                   # block == full extent
        grid = (B,)
        x_map = lambda b: (b, 0, 0)
        w_map = lambda b: (0, 0)
        o_map = lambda b: (b, 0, 0)
        dims = ("parallel",)
    else:
        tp = tile_pix                             # multiple of 128; boundary masked
        grid = (B, pl.cdiv(HW, tp))
        x_map = lambda b, p: (b, 0, p)
        w_map = lambda b, p: (0, 0)
        o_map = lambda b, p: (b, 0, p)
        dims = ("parallel", "parallel")

    # Deepen the input pipeline when the grid is long enough to benefit: the
    # per-tile compute is far shorter than the DMA, so a 3rd buffer keeps the
    # DMA engine busy across step boundaries (most visible on v7x).
    total_steps = 1
    for g in grid:
        total_steps *= g
    n_in_bufs = 3 if total_steps >= 3 else 2
    x_spec_kwargs = {}
    if n_in_bufs == 3:
        x_spec_kwargs["pipeline_mode"] = pl.Buffered(3)

    in_specs = [
        # Batch dim squeezed out of the kernel view.
        pl.BlockSpec((None, C, tp), x_map, **x_spec_kwargs),
        # Tiny fused weight: constant full block.
        pl.BlockSpec((oc_pad, C), w_map),
    ]
    out_specs = [
        pl.BlockSpec((None, slot_ch, tp), o_map),
        pl.BlockSpec((None, mark_ch, tp), o_map),
    ]

    # Bump scoped VMEM only if the chosen tile needs it (v5e default is 16 MiB).
    vmem_need = (n_in_bufs * C * tp + 2 * oc * tp + 2 * oc_pad * C) * itemsize
    cp_kwargs = dict(dimension_semantics=dims)
    if vmem_need > 12 * 1024 * 1024:
        cp_kwargs["vmem_limit_bytes"] = min(int(vmem_need * 2), 100 * 1024 * 1024)

    cost = pl.CostEstimate(
        flops=2 * B * HW * C * oc,
        transcendentals=B * HW * oc,
        bytes_accessed=(B * C * HW + oc * C + B * oc * HW) * itemsize,
    )

    slot_flat, mark_flat = pl.pallas_call(
        _ps_head_kernel,
        out_shape=(
            jax.ShapeDtypeStruct((B, slot_ch, HW), dtype),
            jax.ShapeDtypeStruct((B, mark_ch, HW), dtype),
        ),
        grid_spec=pltpu.PrefetchScalarGridSpec(
            num_scalar_prefetch=0,
            grid=grid,
            in_specs=in_specs,
            out_specs=out_specs,
        ),
        compiler_params=pltpu.CompilerParams(**cp_kwargs),
        cost_estimate=cost,
    )(x, w)

    slot_out = slot_flat.reshape(B, slot_ch, H, W)
    mark_out = mark_flat.reshape(B, mark_ch, H, W)
    return slot_out, mark_out


def _ref(x, w_slot, w_mark):
    slot_ch = w_slot.shape[0]
    mark_ch = w_mark.shape[0]
    C = x.shape[1]
    rs = jax.nn.sigmoid(jnp.einsum("bchw,oc->bohw", x, w_slot.reshape(slot_ch, C)))
    rm = jax.nn.sigmoid(jnp.einsum("bchw,oc->bohw", x, w_mark.reshape(mark_ch, C)))
    return rs, rm


if __name__ == "__main__":
    # Small synthetic config (analogous to args):
    #   swin_out_channel[-1] = 32, slot_channel = 6, mark_channel = 5
    B, C, H, W = 2, 32, 16, 16
    SLOT_CH, MARK_CH = 6, 5

    key = jax.random.PRNGKey(0)
    kx, ks, km, kx2 = jax.random.split(key, 4)
    x = jax.random.normal(kx, (B, C, H, W), dtype=jnp.float32)
    # Deterministic synthetic conv weights (PyTorch shape: (out_ch, in_ch, 1, 1))
    w_slot = jax.random.normal(ks, (SLOT_CH, C, 1, 1), dtype=jnp.float32) * 0.1
    w_mark = jax.random.normal(km, (MARK_CH, C, 1, 1), dtype=jnp.float32) * 0.1

    # Path 1: small-HW fast path (single pixel tile, grid=(B,)).
    slot_out, mark_out = transformer_ps_head(x, w_slot, w_mark)
    jax.block_until_ready((slot_out, mark_out))
    ref_slot, ref_mark = _ref(x, w_slot, w_mark)
    assert slot_out.shape == (B, SLOT_CH, H, W)
    assert mark_out.shape == (B, MARK_CH, H, W)
    assert jnp.allclose(slot_out, ref_slot, atol=1e-5)
    assert jnp.allclose(mark_out, ref_mark, atol=1e-5)

    # Path 2: multi-tile pixel grid + 3-deep input pipelining (forced by a
    # small tile_pix so the small test still exercises the tiled code path).
    H2 = W2 = 32
    x2 = jax.random.normal(kx2, (B, C, H2, W2), dtype=jnp.float32)
    slot2, mark2 = transformer_ps_head(x2, w_slot, w_mark, tile_pix=128)
    jax.block_until_ready((slot2, mark2))
    ref_slot2, ref_mark2 = _ref(x2, w_slot, w_mark)
    assert jnp.allclose(slot2, ref_slot2, atol=1e-5)
    assert jnp.allclose(mark2, ref_mark2, atol=1e-5)

    print("KERNEL_OK")
</pallas_src>

<mosaic_0001>
module attributes {stable_mosaic.version = 11 : i64} {
  func.func @_ps_head_kernel(%arg0: i32, %arg1: memref<1x32x256xf32, #tpu.memory_space<vmem>>, %arg2: memref<13x32xf32, #tpu.memory_space<vmem>>, %arg3: memref<1x6x256xf32, #tpu.memory_space<vmem>>, %arg4: memref<1x5x256xf32, #tpu.memory_space<vmem>>) attributes {dimension_semantics = [#tpu.dimension_semantics<parallel>], iteration_bounds = array<i64: 2>, scalar_prefetch = 0 : i64, scratch_operands = 0 : i64, tpu.core_type = #tpu.core_type<tc>, window_params = [{transform_indices = @transform_0, window_bounds = array<i64: 1, 32, 256>}, {pipeline_mode = #tpu.pipeline_mode<synchronous>, transform_indices = @transform_1, window_bounds = array<i64: 13, 32>}, {transform_indices = @transform_2, window_bounds = array<i64: 1, 6, 256>}, {transform_indices = @transform_3, window_bounds = array<i64: 1, 5, 256>}]} {
    %c0 = arith.constant 0 : index
    %c0_0 = arith.constant 0 : index
    %0 = vector.load %arg2[%c0, %c0_0] : memref<13x32xf32, #tpu.memory_space<vmem>>, vector<13x32xf32>
    %c0_1 = arith.constant 0 : index
    %c0_2 = arith.constant 0 : index
    %c0_3 = arith.constant 0 : index
    %1 = vector.load %arg1[%c0_1, %c0_2, %c0_3] : memref<1x32x256xf32, #tpu.memory_space<vmem>>, vector<1x32x256xf32>
    %2 = vector.shape_cast %1 : vector<1x32x256xf32> to vector<32x256xf32>
    %cst = arith.constant dense<0.000000e+00> : vector<13x256xf32>
    %3 = tpu.matmul %0, %2, %cst {dimension_numbers = #tpu.dot_dimension_numbers<[1], [0], [0], [1], [0, 0, 1, 1], [], []>} : vector<13x32xf32>, vector<32x256xf32>, vector<13x256xf32> -> vector<13x256xf32>
    %4 = arith.negf %3 : vector<13x256xf32>
    %5 = math.exp %4 : vector<13x256xf32>
    %cst_4 = arith.constant 1.000000e+00 : f32
    %6 = vector.broadcast %cst_4 : f32 to vector<13x256xf32>
    %7 = arith.addf %6, %5 : vector<13x256xf32>
    %8 = arith.divf %6, %7 : vector<13x256xf32>
    %9 = vector.extract_strided_slice %8 {offsets = [0, 0], sizes = [6, 256], strides = [1, 1]} : vector<13x256xf32> to vector<6x256xf32>
    %c0_5 = arith.constant 0 : index
    %c0_6 = arith.constant 0 : index
    %c0_7 = arith.constant 0 : index
    %10 = vector.load %arg3[%c0_5, %c0_6, %c0_7] : memref<1x6x256xf32, #tpu.memory_space<vmem>>, vector<1x6x256xf32>
    %11 = vector.shape_cast %10 : vector<1x6x256xf32> to vector<6x256xf32>
    %12 = vector.shape_cast %9 : vector<6x256xf32> to vector<1x6x256xf32>
    tpu.vector_store %arg3[%c0_5, %c0_6, %c0_7], %12 {strides = array<i32>} : memref<1x6x256xf32, #tpu.memory_space<vmem>>, vector<1x6x256xf32>,
    %13 = vector.extract_strided_slice %8 {offsets = [8, 0], sizes = [5, 256], strides = [1, 1]} : vector<13x256xf32> to vector<5x256xf32>
    %c0_8 = arith.constant 0 : index
    %c0_9 = arith.constant 0 : index
    %c0_10 = arith.constant 0 : index
    %14 = vector.load %arg4[%c0_8, %c0_9, %c0_10] : memref<1x5x256xf32, #tpu.memory_space<vmem>>, vector<1x5x256xf32>
    %15 = vector.shape_cast %14 : vector<1x5x256xf32> to vector<5x256xf32>
    %16 = vector.shape_cast %13 : vector<5x256xf32> to vector<1x5x256xf32>
    tpu.vector_store %arg4[%c0_8, %c0_9, %c0_10], %16 {strides = array<i32>} : memref<1x5x256xf32, #tpu.memory_space<vmem>>, vector<1x5x256xf32>,
    return
  }
  func.func @transform_0(%arg0: i32) -> (i32, i32, i32) {
    %c0_i32 = arith.constant 0 : i32
    %c0_i32_0 = arith.constant 0 : i32
    %c0_i32_1 = arith.constant 0 : i32
    return %arg0, %c0_i32, %c0_i32_0 : i32, i32, i32
  }
  func.func @transform_1(%arg0: i32) -> (i32, i32) {
    %c0_i32 = arith.constant 0 : i32
    %c0_i32_0 = arith.constant 0 : i32
    %c0_i32_1 = arith.constant 0 : i32
    return %c0_i32, %c0_i32_0 : i32, i32
  }
  func.func @transform_2(%arg0: i32) -> (i32, i32, i32) {
    %c0_i32 = arith.constant 0 : i32
    %c0_i32_0 = arith.constant 0 : i32
    %c0_i32_1 = arith.constant 0 : i32
    return %arg0, %c0_i32, %c0_i32_0 : i32, i32, i32
  }
  func.func @transform_3(%arg0: i32) -> (i32, i32, i32) {
    %c0_i32 = arith.constant 0 : i32
    %c0_i32_0 = arith.constant 0 : i32
    %c0_i32_1 = arith.constant 0 : i32
    return %arg0, %c0_i32, %c0_i32_0 : i32, i32, i32
  }
}

</mosaic_0001>

<bundles_post_ra>
// kernel: tpu_custom_call.1
= control target key start
LH: loop header
LB: loop body
LE: loop exit
PB: predicated region body
PF: predicated region fallthrough
CT: control target
= control target key end

     0   :  { %9 = vsyncpa [#allocation3], 0  ;;  %s826_s0 = inlined_call_operand.hbm [shape: f32[2,32,256], index: 0, kind: input, shape index: {}]   ;;  %s827_s1 = inlined_call_operand.hbm [shape: f32[13,32], index: 1, kind: input, shape index: {}]   ;;  %s828_s2 = inlined_call_operand.vmem [shape: f32[2,6,256], index: 2, kind: output, shape index: {0}]   ;;  %s829_s3 = inlined_call_operand.vmem [shape: f32[2,5,256], index: 3, kind: output, shape index: {1}]  }
   0x1   :  { %11 = vsyncpa [#allocation3 + $0x1], 0 }
   0x2   :  { %12 = vsyncpa [#allocation5], 0  ;;  %s706_s12 = smov 0   ;;  %s708_s13 = smov 0  }
   0x3   :  { %s710_s14 = smov 0   ;;  %s712_s15 = smov 0  }
   0x4 LB: > { %s725_s16 = sadd.s32 4294967295, %s679_s15   ;;  %p38_p0 = scmp.ne.s32.totalorder %s671_s13, %s667_s12  ;;  %s679_s15 = sphi %s712_s15, %s836_s15   ;;  %s675_s14 = sphi %s710_s14, %s835_s14   ;;  %s671_s13 = sphi %s708_s13, %s834_s13   ;;  %s667_s12 = sphi %s706_s12, %s833_s12  }
   0x5   : > { %p39_p1 = scmp.eq.s32.totalorder %s725_s16, 0  ;;  %p477_p2 = scmp.ge.s32.totalorder %s679_s15, 1 }
   0x6   : > { %p122_p3 = scmp.lt.s32.totalorder %s679_s15, 3  ;;  %s133_s20 = sshll.u32 %s827_s1, 4  ;;  %s134_s20 = int_to_ptr.hbm [resolvable:$true] %s133_s20 }
   0x7   : > { %p733_p4 = por %p39_p1, %p38_p0  ;;  %s681_s22 = smov [#allocation4]  }
   0x8   : > { %p740_p5 = pnand %p477_p2, %p122_p3  ;;  %s135_s23 = sshll.u32 %s681_s22, 4  ;;  %s136_s23 = int_to_ptr.vmem [resolvable:$true] %s135_s23 }
   0x9   : > { %s749_s24 = sadd.s32 1, %s679_s15   ;;  %s682_s25 = smov 128  }
   0xa   : > { %p517_p6 = pneg %p740_p5  ;;  %s683_s26 = smov 8  }
   0xb   : > { %s22_s27 = ssub.s32 %s679_s15, %s749_s24  ;;  %s25_s28 = sadd.s32 1, %s675_s14 }
   0xc   : > { %p518_p7 = pnand %p517_p6, %p39_p1  ;;  %p23_p8 = scmp.eq.s32.totalorder %s22_s27, 0 }
   0xd   : > { %p32_p9 = scmp.ne.s32.totalorder %s675_s14, %s671_s13  ;;  %p33_p10 = scmp.eq.s32.totalorder %s679_s15, 0 }
   0xe   : > { %520 = dma.hbm_to_vmem [thread:$0]  (!%p518_p7), %s134_s20, 256, %s136_s23, [#allocation5], %s682_s25, %s682_s25, %s683_s26  }
   0xf   : > { %p526_p11 = scmp.lt.s32.totalorder %s679_s15, 2  ;;  %p34_p12 = por %p33_p10, %p32_p9 }
  0x10   : > { %s759_s29 = scalar_select %p23_p8, %s675_s14, %s25_s28  }
  0x11   : > { %s149_s30 = sand.u32 1, %s675_s14   ;;  %s500_s5 = sshll.u32 %s679_s15, 6 }
  0x12   : > { %s480_s4 = sshll.u32 %s149_s30, 6  ;;  %s158_s8 = scalar_lea.hbm %s826_s0, %s500_s5 }
  0x13   : > { %s153_s9 = scalar_lea.vmem [#allocation2], %s480_s4  ;;  %s159_s11 = sshll.u32 %s158_s8, 4  ;;  %s160_s11 = int_to_ptr.hbm [resolvable:$true] %s159_s11 }
  0x14   : > { %s161_s10 = sshll.u32 %s153_s9, 4  ;;  %p766_p13 = pnand %p526_p11, %p34_p12  ;;  %s162_s10 = int_to_ptr.vmem [resolvable:$true] %s161_s10 }
  0x15   : > { %s150_s18 = scalar_lea.sflag [#allocation3], %s149_s30  ;;  %s611_s19 = sshra.s32 %s160_s11, 4  ;;  %s612_s19 = int_to_ptr.hbm [resolvable:$true] %s611_s19 }
  0x16   : > { %s613_s20 = scalar_lea.hbm %s612_s19, 64  ;;  %p615_p2 = pneg %p766_p13 }
  0x17   : > { %p614_p0 = scmp.ne.s32.totalorder %s612_s19, %s613_s20  ;;  %s618_s23 = scalar_lea.hbm %s826_s0, 128 }
  0x18   : > { %p619_p7 = scmp.lt.s32.totalorder %s612_s19, %s826_s0  ;;  %p620_p8 = scmp.lt.s32.totalorder %s618_s23, %s613_s20 }
  0x19   : > { %p616_p3 = pnand %p615_p2, %p614_p0 }
  0x1a   : > { %p621_p9 = por %p620_p8, %p619_p7 }
  0x1b   : > { %p617_p6 = pneg %p616_p3 }
  0x1d   : > { %p622_p10 = pnand %p621_p9, %p617_p6 }
  0x1f   : > { %625 = shalt.err (!%p622_p10)
}
  0x20   : > { %s684_s27 = smov 256   ;;  %s685_s28 = smov 16  }
  0x21   : > { %524 = dma.hbm_to_vmem [thread:$0]  (!%p766_p13), %s160_s11, 1024, %s162_s10, %s150_s18, %s684_s27, %s684_s27, %s685_s28  }
  0x22   : > { %173 = sbr.rel (%p740_p5) target bundleno = 213 (0xd5), region = 28  ;;  %s175_s30 = sand.u32 (!%p740_p5), 1, %s671_s13  }
  0x23   : > { %s484_s4 = sshll.u32 (!%p740_p5), %s175_s30, 6  ;;  %s176_s5 = scalar_lea.sflag (!%p740_p5), [#allocation3], %s175_s30 }
  0x24   : > { %s179_s6 = scalar_lea.vmem (!%p740_p5), [#allocation2], %s484_s4 }
  0x27   : > { %658 = dma.done.wait (%p733_p4), %s176_s5, 1024  }
  0x28   : > { %660 = vsyncadd (%p733_p4), %s176_s5, 4294966272 }
  0x29   : > { %662 = dma.done.wait (%p39_p1), [#allocation5], 256  }
  0x2a   : > { %664 = vsyncadd (%p39_p1), [#allocation5], 4294967040  ;;  %v231_v0 = vld [vmem:[%s179_s6 + $0x30] sm:$0xff]  ;;  %v232_v1 = vld [vmem:[%s179_s6 + $0x38] sm:$0xff]  ;;  %vm233_vm0 = vcmask 261120   ;;  %p213_p1 = scmp.lt.s32.totalorder %s725_s16, 1 }
  0x2b   : > { %v229_v2 = vld [vmem:[%s179_s6 + $0x20] sm:$0xff]  ;;  %252 = vmatpush.msra.mxu0 %v231_v0  ;;  %503 = vmatpush.msra.mxu2 %v231_v0  ;;  %v230_v3 = vld [vmem:[%s179_s6 + $0x28] sm:$0xff]  ;;  %v227_v4 = vld [vmem:[%s179_s6 + $0x10] sm:$0xff] }
  0x2c   : > { %275 = vmatpush.msra.mxu1 %v232_v1  ;;  %507 = vmatpush.msra.mxu3 %v232_v1  ;;  %v228_v5 = vld [vmem:[%s179_s6 + $0x18] sm:$0xff]  ;;  %v225_v6 = vld [vmem:[%s179_s6] sm:$0xff]  ;;  %v226_v7 = vld [vmem:[%s179_s6 + $0x8] sm:$0xff]  ;;  %s838_s16 = smov (!%p213_p1, %s725_s16), 1 }
  0x2d   : > { %253 = vmatpush.msra.mxu0 %v229_v2  ;;  %504 = vmatpush.msra.mxu2 %v229_v2  ;;  %v223_v8 = vld [vmem:[#allocation4] sm:$0xff]  ;;  %v224_v9 = vld [vmem:[#allocation4 + $0x8] sm:$0x1f]  ;;  %s501_s17 = sshll.u32 %s838_s16, 4 }
  0x2e   : > { %276 = vmatpush.msra.mxu1 %v230_v3  ;;  %508 = vmatpush.msra.mxu3 %v230_v3  ;;  %s217_s8 = scalar_lea.vmem %s828_s2, %s501_s17  ;;  %s222_s11 = scalar_lea.vmem %s829_s3, %s501_s17 }
  0x2f   : > { %254 = vmatpush.msra.mxu0 %v227_v4  ;;  %505 = vmatpush.msra.mxu2 %v227_v4 }
  0x30   : > { %277 = vmatpush.msra.mxu1 %v228_v5  ;;  %509 = vmatpush.msra.mxu3 %v228_v5 }
  0x31   : > { %255 = vmatpush.msra.mxu0 %v225_v6  ;;  %506 = vmatpush.msra.mxu2 %v225_v6 }
  0x32   : > { %278 = vmatpush.msra.mxu1 %v226_v7  ;;  %510 = vmatpush.msra.mxu3 %v226_v7 }
  0x33   : > { %490 = vmatmul.msk.f32.vlgmr.msra.gmra.mxu0 %vm233_vm0, %v223_v8  ;;  %491 = vmatmul.msk.f32.vlgmr.msra.gmra.mxu2 %vm233_vm0, %v224_v9 }
  0x34   : > { %492 = vmatmul.msk.f32.vlgmr.msra.gmra.mxu1 %vm233_vm0, %v223_v8  ;;  %493 = vmatmul.msk.f32.vlgmr.msra.gmra.mxu3 %vm233_vm0, %v224_v9 }
  0xb0   : > { %v257_v10 = vpop.f32.mrf.mxu0 }
  0xb1   : > { %v494_v11 = vmul.f32 -1.442695, %v257_v10  ;;  %v280_v12 = vpop.f32.mrf.mxu1 }
  0xb2   : > { %v495_v13 = vmul.f32 -1.442695, %v280_v12 }
  0xb3   : > { %565 = vpow2.f32 %v494_v11 }
  0xb4   : > { %567 = vpow2.f32 %v495_v13 }
  0xb6   : > { %v260_v14 = vpop.f32.mrf.mxu2 }
  0xb7   : > { %v496_v15 = vmul.f32 -1.442695, %v260_v14  ;;  %v283_v16 = vpop.f32.mrf.mxu3 }
  0xb8   : > { %v497_v17 = vmul.f32 -1.442695, %v283_v16 }
  0xb9   : > { %v566_v18 = vpop.eup %565  ;;  %569 = vpow2.f32 %v496_v15 }
  0xba   : > { %v568_v19 = vpop.eup %567  ;;  %v298_v20 = vadd.f32 1.0, %v566_v18  ;;  %571 = vpow2.f32 %v497_v17 }
  0xbb   : > { %v299_v21 = vadd.f32 1.0, %v568_v19 }
  0xbc   : > { %573 = vrcp.f32 %v298_v20  ;;  %v311_v31 = vand.u32 2147483647, %v298_v20  ;;  %v313_v32 = vand.u32 2147483648, %v298_v20  ;;  %vm307_vm1 = vweird.f32 %v298_v20 }
  0xbd   : > { %575 = vrcp.f32 %v299_v21  ;;  %v326_v34 = vand.u32 2147483647, %v299_v21  ;;  %v328_v36 = vand.u32 2147483648, %v299_v21  ;;  %vm322_vm3 = vweird.f32 %v299_v21 }
  0xbe   : > { %vm312_vm5 = vcmp.eq.f32.partialorder %v311_v31, 8.507059e+37  ;;  %v314_v42 = vor.u32 1.1754944e-38, %v313_v32 }
  0xbf   : > { %v570_v22 = vpop.eup %569  ;;  %vm327_vm7 = vcmp.eq.f32.partialorder %v326_v34, 8.507059e+37  ;;  %v329_v46 = vor.u32 1.1754944e-38, %v328_v36 }
  0xc0   : > { %v572_v23 = vpop.eup %571  ;;  %v300_v24 = vadd.f32 1.0, %v570_v22 }
  0xc1   : > { %v792_v25 = vadd.f32 1.0, %v572_v23 }
  0xc2   : > { %v574_v26 = vpop.eup %573  ;;  %577 = vrcp.f32 %v300_v24  ;;  %v341_v48 = vand.u32 2147483647, %v300_v24  ;;  %v343_v51 = vand.u32 2147483648, %v300_v24  ;;  %vm337_vm11 = vweird.f32 %v300_v24 }
  0xc3   : > { %v576_v27 = vpop.eup %575  ;;  %v303_v28 = vmul.f32 %v574_v26, %v298_v20  ;;  %579 = vrcp.f32 %v792_v25  ;;  %vm308_vm2 = vweird.f32 %v574_v26  ;;  %v358_v55 = vand.u32 2147483648, %v792_v25 }
  0xc4   : > { %v318_v29 = vmul.f32 %v576_v27, %v299_v21  ;;  %vm323_vm4 = vweird.f32 %v576_v27  ;;  %vm309_vm6 = vmor %vm307_vm1, %vm308_vm2  ;;  %v356_v57 = vand.u32 2147483647, %v792_v25  ;;  %v344_v59 = vor.u32 1.1754944e-38, %v343_v51 }
  0xc5   : > { %v304_v30 = vsub.f32 1.0, %v303_v28  ;;  %vm324_vm8 = vmor %vm322_vm3, %vm323_vm4  ;;  %vm352_vm13 = vweird.f32 %v792_v25  ;;  %vm342_vm14 = vcmp.eq.f32.partialorder %v341_v48, 8.507059e+37  ;;  %v359_v62 = vor.u32 1.1754944e-38, %v358_v55 }
  0xc6   : > { %v319_v33 = vsub.f32 1.0, %v318_v29  ;;  %vm357_vm0 = vcmp.eq.f32.partialorder %v356_v57, 8.507059e+37 }
  0xc7   : > { %v305_v35 = vmul.f32 %v574_v26, %v304_v30 }
  0xc8   : > { %v578_v37 = vpop.eup %577  ;;  %v320_v38 = vmul.f32 %v576_v27, %v319_v33 }
  0xc9   : > { %v580_v39 = vpop.eup %579  ;;  %v306_v40 = vadd.f32 %v574_v26, %v305_v35  ;;  %v333_v41 = vmul.f32 %v578_v37, %v300_v24  ;;  %vm338_vm9 = vweird.f32 %v578_v37 }
  0xca   : > { %v321_v43 = vadd.f32 %v576_v27, %v320_v38  ;;  %v348_v44 = vmul.f32 %v580_v39, %v792_v25  ;;  %vm353_vm10 = vweird.f32 %v580_v39  ;;  %vm339_vm12 = vmor %vm337_vm11, %vm338_vm9 }
  0xcb   : > { %v310_v45 = vsel %vm309_vm6, %v574_v26, %v306_v40  ;;  %v334_v47 = vsub.f32 1.0, %v333_v41  ;;  %vm354_vm15 = vmor %vm352_vm13, %vm353_vm10 }
  0xcc   : > { %v315_v49 = vsel %vm312_vm5, %v314_v42, %v310_v45  ;;  %v325_v50 = vsel %vm324_vm8, %v576_v27, %v321_v43  ;;  %v349_v52 = vsub.f32 1.0, %v348_v44 }
  0xcd   : > { %362 = vst [vmem:[%s217_s8] sm:$0x3f] %v315_v49  ;;  %v330_v53 = vsel %vm327_vm7, %v329_v46, %v325_v50  ;;  %v335_v54 = vmul.f32 %v578_v37, %v334_v47 }
  0xce   : > { %363 = vst [vmem:[%s217_s8 + $0x8] sm:$0x3f] %v330_v53  ;;  %v350_v56 = vmul.f32 %v580_v39, %v349_v52 }
  0xcf   : > { %v336_v58 = vadd.f32 %v578_v37, %v335_v54 }
  0xd0   : > { %v351_v60 = vadd.f32 %v580_v39, %v350_v56 }
  0xd1   : > { %v340_v61 = vsel %vm339_vm12, %v578_v37, %v336_v58 }
  0xd2   : > { %v345_v63 = vsel %vm342_vm14, %v344_v59, %v340_v61  ;;  %v355_v0 = vsel %vm354_vm15, %v580_v39, %v351_v60 }
  0xd3   : > { %364 = vst [vmem:[%s222_s11] sm:$0x1f] %v345_v63  ;;  %v360_v1 = vsel %vm357_vm0, %v359_v62, %v355_v0 }
  0xd4   : > { %365 = vst [vmem:[%s222_s11 + $0x8] sm:$0x1f] %v360_v1 }
  0xd5 PF: > { %p15_p4 = scmp.ge.s32.totalorder %s749_s24, 4   ;;  %s833_s12 = smov %s671_s13 }
  0xd6   : > { %s834_s13 = smov %s675_s14  ;;  %s835_s14 = smov %s759_s29 }
  0xd7   : > { %s836_s15 = smov %s749_s24  ;;  %17 = sbr.rel (!%p15_p4) target bundleno = 4 (0x4), region = 84 }
  0xdc   :  { %403 = vsyncpa [#allocation3], 1 }
  0xdd   :  { %405 = vsyncpa [#allocation3 + $0x1], 1 }
  0xde   :  { %406 = vsyncpa [#allocation5], 1 }

</bundles_post_ra>
